<compile_context>
chip_gen: v7x
topology: tpu7x:2x2x1
jax: 0.10.0
libtpu: 0.0.40
codegen_flags: <defaults>
</compile_context>

<pallas_src>
import jax
import jax.numpy as jnp
from jax.experimental import pallas as pl
from jax.experimental.pallas import tpu as pltpu

INPUT_SIZE = 28 * 28   # 784
NUM_CLASSES = 10
N_PAD = 128            # MXU-friendly lane width for the resident weight


def _round_up(x, m):
    return ((x + m - 1) // m) * m


def _linear_kernel(x_ref, w_ref, b_ref, o_ref):
    # x_ref: (TB, K) f32        -- per-step batch tile, cast to bf16 here
    # w_ref: (K, N_PAD) bf16    -- VMEM-resident padded W^T
    # b_ref: (1, NUM_CLASSES) f32
    # o_ref: (TB, NUM_CLASSES) f32
    x_bf = x_ref[...].astype(jnp.bfloat16)
    acc = jnp.dot(x_bf, w_ref[...], preferred_element_type=jnp.float32)
    # Keep the 128-lane accumulator for the MXU; store only the 10 real lanes.
    o_ref[...] = acc[:, :NUM_CLASSES] + b_ref[...]


def prepare_params(w, b, *, compute_dtype=jnp.bfloat16):
    """One-time parameter prep (hoisted out of the per-call forward).

    w: (NUM_CLASSES, INPUT_SIZE) f32, b: (NUM_CLASSES,) f32.
    Returns (w_t_padded, bias_2d): (K, N_PAD) bf16 and (1, NUM_CLASSES) f32.
    """
    n, k = w.shape
    w_t = jnp.pad(w.T.astype(compute_dtype), ((0, 0), (0, N_PAD - n)))
    b2 = b.astype(jnp.float32).reshape(1, n)
    return w_t, b2


def logistic_regression_forward(x, w_t, b2, *, block_b=1024):
    """nn.Linear forward: x @ w.T + b, with (w_t, b2) from prepare_params.

    x: (B, INPUT_SIZE) f32.  Returns (B, NUM_CLASSES) f32.
    """
    B, K = x.shape
    N = b2.shape[1]

    # Batch tile: large enough to amortize per-step overhead, but keep >=2
    # grid steps for v7x megacore and stay under v5e's scoped-VMEM default.
    tb = max(8, min(block_b, _round_up(pl.cdiv(B, 2), 8)))
    b_rows = _round_up(B, tb)

    # Only batch rows are padded (if needed); K and the output stay unpadded.
    x_p = x if b_rows == B else jnp.pad(x, ((0, b_rows - B), (0, 0)))

    cost = pl.CostEstimate(
        flops=2 * b_rows * K * N_PAD,
        transcendentals=0,
        bytes_accessed=(b_rows * K * jnp.dtype(x.dtype).itemsize   # x (f32)
                        + K * N_PAD * 2                            # W^T (bf16, resident)
                        + N * 4                                    # bias
                        + b_rows * N * 4),                         # out (unpadded)
    )

    out_p = pl.pallas_call(
        _linear_kernel,
        out_shape=jax.ShapeDtypeStruct((b_rows, N), jnp.float32),
        grid=(b_rows // tb,),
        in_specs=[
            pl.BlockSpec((tb, K), lambda i: (i, 0)),       # x tile per step
            pl.BlockSpec((K, N_PAD), lambda i: (0, 0)),    # weight: resident
            pl.BlockSpec((1, N), lambda i: (0, 0)),        # bias: resident
        ],
        out_specs=pl.BlockSpec((tb, N), lambda i: (i, 0)),
        compiler_params=pltpu.CompilerParams(
            dimension_semantics=("parallel",)),
        cost_estimate=cost,
    )(x_p, w_t, b2)

    return out_p if b_rows == B else out_p[:B]


if __name__ == "__main__":
    key = jax.random.PRNGKey(0)
    kx, kw, kb = jax.random.split(key, 3)

    # Batch that is not a tile multiple -> exercises row padding and a
    # 2-step parallel grid (tb = 104 from the >=2-steps heuristic).
    batch = 200

    # Deterministic parameter init mimicking nn.Linear default:
    # U(-1/sqrt(in_features), 1/sqrt(in_features))
    bound = 1.0 / (INPUT_SIZE ** 0.5)
    w = jax.random.uniform(kw, (NUM_CLASSES, INPUT_SIZE),
                           minval=-bound, maxval=bound, dtype=jnp.float32)
    b = jax.random.uniform(kb, (NUM_CLASSES,),
                           minval=-bound, maxval=bound, dtype=jnp.float32)
    x = jax.random.normal(kx, (batch, INPUT_SIZE), dtype=jnp.float32)

    # One-time parameter prep (would live at module init in real code).
    w_t, b2 = prepare_params(w, b)

    out = jax.block_until_ready(logistic_regression_forward(x, w_t, b2))

    assert out.shape == (batch, NUM_CLASSES)

    # Tight check vs. a bf16-rounded-input reference (same arithmetic as the
    # kernel: bf16 products, f32 accumulation, f32 bias).
    ref_bf = (x.astype(jnp.bfloat16).astype(jnp.float32)
              @ w.astype(jnp.bfloat16).astype(jnp.float32).T) + b
    assert jnp.allclose(out, ref_bf, atol=1e-3, rtol=1e-3)

    # Loose check vs. the full-f32 PyTorch nn.Linear semantics
    # (tolerance widened for the in-kernel bf16 compute dtype).
    ref = x @ w.T + b
    assert jnp.allclose(out, ref, atol=2e-2, rtol=2e-2)

    print("KERNEL_OK")
</pallas_src>

<mosaic_0001>
module attributes {stable_mosaic.version = 11 : i64} {
  func.func @_linear_kernel(%arg0: i32, %arg1: memref<104x784xf32, #tpu.memory_space<vmem>>, %arg2: memref<784x128xbf16, #tpu.memory_space<vmem>>, %arg3: memref<1x10xf32, #tpu.memory_space<vmem>>, %arg4: memref<104x10xf32, #tpu.memory_space<vmem>>) attributes {dimension_semantics = [#tpu.dimension_semantics<parallel>], iteration_bounds = array<i64: 2>, scalar_prefetch = 0 : i64, scratch_operands = 0 : i64, tpu.core_type = #tpu.core_type<tc>, window_params = [{transform_indices = @transform_0, window_bounds = array<i64: 104, 784>}, {pipeline_mode = #tpu.pipeline_mode<synchronous>, transform_indices = @transform_1, window_bounds = array<i64: 784, 128>}, {pipeline_mode = #tpu.pipeline_mode<synchronous>, transform_indices = @transform_2, window_bounds = array<i64: 1, 10>}, {transform_indices = @transform_3, window_bounds = array<i64: 104, 10>}]} {
    %c0 = arith.constant 0 : index
    %c0_0 = arith.constant 0 : index
    %0 = vector.load %arg1[%c0, %c0_0] : memref<104x784xf32, #tpu.memory_space<vmem>>, vector<104x784xf32>
    %1 = arith.truncf %0 : vector<104x784xf32> to vector<104x784xbf16>
    %c0_1 = arith.constant 0 : index
    %c0_2 = arith.constant 0 : index
    %2 = vector.load %arg2[%c0_1, %c0_2] : memref<784x128xbf16, #tpu.memory_space<vmem>>, vector<784x128xbf16>
    %cst = arith.constant dense<0.000000e+00> : vector<104x128xf32>
    %3 = tpu.matmul %1, %2, %cst {dimension_numbers = #tpu.dot_dimension_numbers<[1], [0], [0], [1], [0, 0, 1, 1], [], []>} : vector<104x784xbf16>, vector<784x128xbf16>, vector<104x128xf32> -> vector<104x128xf32>
    %4 = vector.extract_strided_slice %3 {offsets = [0, 0], sizes = [104, 10], strides = [1, 1]} : vector<104x128xf32> to vector<104x10xf32>
    %c0_3 = arith.constant 0 : index
    %c0_4 = arith.constant 0 : index
    %5 = vector.load %arg3[%c0_3, %c0_4] : memref<1x10xf32, #tpu.memory_space<vmem>>, vector<1x10xf32>
    %6 = vector.broadcast %5 : vector<1x10xf32> to vector<104x10xf32>
    %7 = arith.addf %4, %6 : vector<104x10xf32>
    %c0_5 = arith.constant 0 : index
    %c0_6 = arith.constant 0 : index
    %8 = vector.load %arg4[%c0_5, %c0_6] : memref<104x10xf32, #tpu.memory_space<vmem>>, vector<104x10xf32>
    tpu.vector_store %arg4[%c0_5, %c0_6], %7 {strides = array<i32>} : memref<104x10xf32, #tpu.memory_space<vmem>>, vector<104x10xf32>,
    return
  }
  func.func @transform_0(%arg0: i32) -> (i32, i32) {
    %c0_i32 = arith.constant 0 : i32
    %c0_i32_0 = arith.constant 0 : i32
    return %arg0, %c0_i32 : i32, i32
  }
  func.func @transform_1(%arg0: i32) -> (i32, i32) {
    %c0_i32 = arith.constant 0 : i32
    %c0_i32_0 = arith.constant 0 : i32
    %c0_i32_1 = arith.constant 0 : i32
    return %c0_i32, %c0_i32_0 : i32, i32
  }
  func.func @transform_2(%arg0: i32) -> (i32, i32) {
    %c0_i32 = arith.constant 0 : i32
    %c0_i32_0 = arith.constant 0 : i32
    %c0_i32_1 = arith.constant 0 : i32
    return %c0_i32, %c0_i32_0 : i32, i32
  }
  func.func @transform_3(%arg0: i32) -> (i32, i32) {
    %c0_i32 = arith.constant 0 : i32
    %c0_i32_0 = arith.constant 0 : i32
    return %arg0, %c0_i32 : i32, i32
  }
}

</mosaic_0001>

<bundles_post_ra>
// kernel: tpu_custom_call.1
= control target key start
LH: loop header
LB: loop body
LE: loop exit
PB: predicated region body
PF: predicated region fallthrough
CT: control target
= control target key end

     0   :  { %8 = vsyncpa [#allocation3], 0  ;;  %s2087_s0 = inlined_call_operand.hbm [shape: f32[208,784], index: 0, kind: input, shape index: {}]   ;;  %s2088_s1 = inlined_call_operand.hbm [shape: bf16[784,128], index: 1, kind: input, shape index: {}]   ;;  %s2089_s2 = inlined_call_operand.vmem [shape: f32[1,10], index: 2, kind: input, shape index: {}]   ;;  %s2090_s3 = inlined_call_operand.vmem [shape: f32[208,10], index: 3, kind: output, shape index: {}]  }
   0x1   :  { %10 = vsyncpa [#allocation3 + $0x1], 0 }
   0x2   :  { %11 = vsyncpa [#allocation5], 0  ;;  %s1742_s12 = smov 0   ;;  %s1744_s13 = smov 0  }
   0x3   :  { %s1746_s14 = smov 0   ;;  %s1748_s15 = smov 0  }
   0x4 LB: > { %s1227_s16 = sadd.s32 4294967295, %s1712_s15   ;;  %p37_p0 = scmp.ne.s32.totalorder %s1704_s13, %s1700_s12  ;;  %s1712_s15 = sphi %s1748_s15, %s2106_s15   ;;  %s1708_s14 = sphi %s1746_s14, %s2105_s14   ;;  %s1704_s13 = sphi %s1744_s13, %s2104_s13   ;;  %s1700_s12 = sphi %s1742_s12, %s2103_s12  }
   0x5   : > { %p1764_p1 = scmp.eq.s32.totalorder %s1227_s16, 0  ;;  %p1229_p2 = scmp.ge.s32.totalorder %s1712_s15, 1 }
   0x6   : > { %p116_p3 = scmp.lt.s32.totalorder %s1712_s15, 3  ;;  %s1714_s20 = smov [#allocation4]  }
   0x7   : > { %s2095_s17 = scalar_select %p1764_p1, 1, 0 }
   0x8   : > { %p1772_p4 = por %p1764_p1, %p37_p0  ;;  %p1776_p5 = pnand %p1229_p2, %p116_p3 }
   0x9   : > { %s128_s21 = sshll.u32 %s1714_s20, 4  ;;  %s1789_s23 = sadd.s32 1, %s1712_s15   ;;  %s129_s21 = int_to_ptr.vmem [resolvable:$true] %s128_s21 }
   0xa   : > { %s2096_s18 = scalar_select %p1772_p4, 1, 0 }
   0xb   : > { %s2097_s19 = scalar_select %p1776_p5, 1, 0 }
   0xc   : > { %p1516_p6 = pneg %p1776_p5  ;;  %s21_s24 = ssub.s32 %s1712_s15, %s1789_s23 }
   0xd   : > { %s1616_s27 = scalar_lea.hbm %s2088_s1, 6272 }
   0xe   : > { %p1784_p7 = pnand %p1516_p6, %p1764_p1  ;;  %p1617_p8 = scmp.ne.s32.totalorder %s2088_s1, %s1616_s27 }
   0xf   : > { %p1623_p12 = scmp.lt.u32.totalorder %s1616_s27, %s2088_s1 }
  0x10   : > { %p1618_p9 = pneg %p1784_p7 }
  0x12   : > { %p1619_p10 = pnand %p1618_p9, %p1617_p8 }
  0x14   : > { %p1620_p11 = pneg %p1619_p10 }
  0x16   : > { %p1625_p13 = pnand %p1623_p12, %p1620_p11 }
  0x18   : > { %1628 = shalt.err (!%p1625_p13)
}
  0x19   : > { %s1629_s5 = scalar_lea.vmem %s129_s21, 6272  ;;  %p1637_p6 = scmp.lt.s32.totalorder %s129_s21, %s129_s21 }
  0x1a   : > { %p1630_p0 = scmp.ne.s32.totalorder %s129_s21, %s1629_s5  ;;  %p1638_p1 = scmp.lt.s32.totalorder %s1629_s5, %s1629_s5 }
  0x1c   : > { %p1632_p2 = pnand %p1630_p0, %p1618_p9  ;;  %p1639_p4 = por %p1638_p1, %p1637_p6 }
  0x1e   : > { %p1633_p3 = pneg %p1632_p2 }
  0x20   : > { %p1640_p5 = pnand %p1639_p4, %p1633_p3 }
  0x22   : > { %1643 = shalt.err (!%p1640_p5)
}
  0x23   : > { %s1715_s6 = smov 64   ;;  %s1716_s7 = smov 4  }
  0x24   : > { %1519 = dma.hbm_to_vmem [thread:$0]  (!%p1784_p7), %s2088_s1, 6272, %s129_s21, [#allocation5], %s1715_s6, %s1715_s6, %s1716_s7  }
  0x25   : > { %p22_p8 = scmp.eq.s32.totalorder %s21_s24, 0  ;;  %s24_s10 = sadd.s32 1, %s1708_s14 }
  0x26   : > { %p31_p1 = scmp.ne.s32.totalorder %s1708_s14, %s1704_s13  ;;  %p32_p4 = scmp.eq.s32.totalorder %s1712_s15, 0 }
  0x27   : > { %s1814_s11 = scalar_select %p22_p8, %s1708_s14, %s24_s10  }
  0x28   : > { %p33_p5 = por %p32_p4, %p31_p1  ;;  %p1525_p9 = scmp.lt.s32.totalorder %s1712_s15, 2 }
  0x29   : > { %s145_s12 = sand.u32 1, %s1708_s14   ;;  %s1526_s20 = smul.u32 11648, %s1712_s15 }
  0x2a   : > { %s1507_s25 = smul.u32 728, %s145_s12  ;;  %p1824_p7 = pnand %p1525_p9, %p33_p5 }
  0x2b   : > { %s1822_s28 = scalar_lea.hbm %s2087_s0, %s1526_s20  ;;  %s1830_s29 = scalar_lea.sflag [#allocation3], %s145_s12 }
  0x2c   : > { %s149_s22 = scalar_lea.vmem [#allocation2], %s1507_s25  ;;  %s1644_s30 = scalar_lea.hbm %s1822_s28, 11648 }
  0x2d   : > { %s157_s24 = sshll.u32 %s149_s22, 4  ;;  %p1645_p10 = scmp.ne.s32.totalorder %s1822_s28, %s1644_s30  ;;  %s1828_s24 = int_to_ptr.vmem [resolvable:$true] %s157_s24 }
  0x2e   : > { %p1646_p11 = pneg %p1824_p7  ;;  %s1649_s6 = scalar_lea.hbm %s2087_s0, 23296 }
  0x2f   : > { %p1650_p0 = scmp.lt.u32.totalorder %s1822_s28, %s2087_s0  ;;  %p1651_p2 = scmp.lt.u32.totalorder %s1649_s6, %s1644_s30 }
  0x30   : > { %p1647_p12 = pnand %p1646_p11, %p1645_p10  ;;  %p1653_p6 = scmp.lt.u32.totalorder %s1644_s30, %s1822_s28 }
  0x31   : > { %p1652_p3 = por %p1651_p2, %p1650_p0 }
  0x32   : > { %p1648_p13 = pneg %p1647_p12 }
  0x33   : > { %p1654_p8 = por %p1653_p6, %p1652_p3 }
  0x35   : > { %p1655_p1 = pnand %p1654_p8, %p1648_p13 }
  0x37   : > { %1658 = shalt.err (!%p1655_p1)
}
  0x38   : > { %s1659_s9 = scalar_lea.vmem %s1828_s24, 11648  ;;  %s1717_s10 = smov [#allocation2]  }
  0x39   : > { %p1660_p4 = scmp.ne.s32.totalorder %s1828_s24, %s1659_s9  ;;  %s1664_s12 = sshll.u32 %s1717_s10, 4  ;;  %s1665_s12 = int_to_ptr.vmem [resolvable:$false] %s1664_s12 }
  0x3a   : > { %s1666_s20 = scalar_lea.vmem %s1665_s12, 23296  ;;  %p1667_p10 = scmp.lt.s32.totalorder %s1828_s24, %s1665_s12 }
  0x3b   : > { %p1662_p5 = pnand %p1660_p4, %p1646_p11  ;;  %p1668_p12 = scmp.lt.s32.totalorder %s1666_s20, %s1659_s9 }
  0x3d   : > { %p1663_p9 = pneg %p1662_p5  ;;  %p1669_p0 = por %p1668_p12, %p1667_p10 }
  0x3f   : > { %p1670_p2 = pnand %p1669_p0, %p1663_p9 }
  0x41   : > { %1673 = shalt.err (!%p1670_p2)
}
  0x42   : > { %s1718_s25 = smov 896   ;;  %s1719_s26 = smov 56  }
  0x43   : > { %1523 = dma.hbm_to_vmem [thread:$0]  (!%p1824_p7), %s1822_s28, 11648, %s1828_s24, %s1830_s29, %s1718_s25, %s1718_s25, %s1719_s26  }
  0x44   : > { %p2100_p11 = scmp.ne.s32.totalorder %s2097_s19, 0 }
  0x45   : > { %s171_s27 = sand.u32 (!%p2100_p11), 1, %s1704_s13   ;;  %p2101_p13 = scmp.ne.s32.totalorder (!%p2100_p11), %s2096_s18, 0 }
  0x46   : > { %169 = sbr.rel (%p2100_p11) target bundleno = 441 (0x1b9), region = 32  ;;  %s172_s30 = scalar_lea.sflag (!%p2100_p11), [#allocation3], %s171_s27 }
  0x47   : > { %s1509_s22 = smul.u32 (!%p2100_p11), 728, %s171_s27 }
  0x49   : > { %s1861_s4 = scalar_lea.vmem (!%p2100_p11), [#allocation2], %s1509_s22 }
  0x4d   : > { %1691 = dma.done.wait (%p2101_p13), %s172_s30, 11648  }
  0x4e   : > { %1693 = vsyncadd (%p2101_p13), %s172_s30, 4294955648  ;;  %p2102_p3 = scmp.ne.s32.totalorder %s2095_s17, 0 }
  0x50   : > { %1695 = dma.done.wait (%p2102_p3), [#allocation5], 6272  }
  0x51   : > { %1697 = vsyncadd (%p2102_p3), [#allocation5], 4294961024  ;;  %v1567_v0 = vld [vmem:[#allocation4 + $0x40] sm:$0xff]   ;;  %v1571_v4 = vld [vmem:[#allocation4 + $0x48] sm:$0xff]   ;;  %v1720_v43 = vmov 0.0   ;;  %vm1721_vm0 = vmmov 0  }
  0x52   : > { %v1568_v1 = vld [vmem:[#allocation4 + $0xc0] sm:$0xff]   ;;  %1295 = vmatprep.subr.bf16.mxu0 %v1567_v0  ;;  %v1572_v5 = vld [vmem:[#allocation4 + $0xc8] sm:$0xff]   ;;  %v1575_v8 = vld [vmem:[#allocation4 + $0x50] sm:$0xff]   ;;  %vm742_vm1 = vcmask 130048   ;;  %s203_s17 = smul.u32 13, %s1227_s16  ;;  %vm1136_vm2 = vcmask 80896  }
  0x53   : > { %v1569_v2 = vld [vmem:[#allocation4] sm:$0xff]   ;;  %1353 = vmatprep.subr.bf16.mxu1 %v1568_v1  ;;  %v1573_v6 = vld [vmem:[#allocation4 + $0x8] sm:$0xff]   ;;  %v1576_v9 = vld [vmem:[#allocation4 + $0xd0] sm:$0xff]  }
  0x54   : > { %v1570_v3 = vld [vmem:[#allocation4 + $0x80] sm:$0xff]   ;;  %1296 = vmatpush3.bf16.msra.mxu0 %v1569_v2  ;;  %v1574_v7 = vld [vmem:[#allocation4 + $0x88] sm:$0xff]   ;;  %v1577_v10 = vld [vmem:[#allocation4 + $0x10] sm:$0xff]   ;;  %p204_p7 = scmp.lt.s32.totalorder %s203_s17, 25 }
  0x55   : > { %1354 = vmatpush3.bf16.msra.mxu1 %v1570_v3  ;;  %1297 = vmatprep.subr.bf16.mxu0 %v1571_v4  ;;  %v1578_v11 = vld [vmem:[#allocation4 + $0x90] sm:$0xff]   ;;  %v1579_v12 = vld [vmem:[#allocation4 + $0x58] sm:$0xff]   ;;  %v1583_v16 = vld [vmem:[#allocation4 + $0x60] sm:$0xff]  }
  0x56   : > { %1355 = vmatprep.subr.bf16.mxu1 %v1572_v5  ;;  %v1580_v13 = vld [vmem:[#allocation4 + $0xd8] sm:$0xff]   ;;  %v1584_v17 = vld [vmem:[#allocation4 + $0xe0] sm:$0xff]   ;;  %v1587_v20 = vld [vmem:[#allocation4 + $0x68] sm:$0xff]   ;;  %s2108_s17 = smov (!%p204_p7, %s203_s17), 25 }
  0x57   : > { %v1581_v14 = vld [vmem:[#allocation4 + $0x18] sm:$0xff]   ;;  %v1585_v18 = vld [vmem:[#allocation4 + $0x20] sm:$0xff]   ;;  %v1588_v21 = vld [vmem:[#allocation4 + $0xe8] sm:$0xff]   ;;  %s1235_s15 = sshll.u32 %s2108_s17, 3 }
  0x58   : > { %1298 = vmatpush3.bf16.msra.mxu0 %v1573_v6  ;;  %v1582_v15 = vld [vmem:[#allocation4 + $0x98] sm:$0xff]   ;;  %v1586_v19 = vld [vmem:[#allocation4 + $0xa0] sm:$0xff]   ;;  %v1589_v22 = vld [vmem:[#allocation4 + $0x28] sm:$0xff]   ;;  %s2022_s21 = scalar_lea.vmem %s2090_s3, %s1235_s15 }
  0x59   : > { %1356 = vmatpush3.bf16.msra.mxu1 %v1574_v7  ;;  %1299 = vmatprep.subr.bf16.mxu0 %v1575_v8  ;;  %v1590_v23 = vld [vmem:[#allocation4 + $0xa8] sm:$0xff]   ;;  %v1591_v24 = vld [vmem:[#allocation4 + $0x70] sm:$0xff]   ;;  %v1595_v28 = vld [vmem:[#allocation4 + $0x78] sm:$0xff]  }
  0x5a   : > { %1357 = vmatprep.subr.bf16.mxu1 %v1576_v9  ;;  %v1592_v25 = vld [vmem:[#allocation4 + $0xf0] sm:$0xff]   ;;  %v1596_v29 = vld [vmem:[#allocation4 + $0xf8] sm:$0xff]   ;;  %v213_v34 = vld [vmem:[%s1861_s4 + $0x18] sm:$0xff] }
  0x5b   : > { %v1593_v26 = vld [vmem:[#allocation4 + $0x30] sm:$0xff]   ;;  %v1597_v30 = vld [vmem:[#allocation4 + $0x38] sm:$0xff]   ;;  %v217_v38 = vld [vmem:[%s1861_s4 + $0x38] sm:$0xff] }
  0x5c   : > { %1300 = vmatpush3.bf16.msra.mxu0 %v1577_v10  ;;  %v1594_v27 = vld [vmem:[#allocation4 + $0xb0] sm:$0xff]   ;;  %v1598_v31 = vld [vmem:[#allocation4 + $0xb8] sm:$0xff]   ;;  %v1599_v45 = vld [vmem:[#allocation4 + $0x140] sm:$0xff]  }
  0x5d   : > { %1358 = vmatpush3.bf16.msra.mxu1 %v1578_v11  ;;  %1301 = vmatprep.subr.bf16.mxu0 %v1579_v12  ;;  %v211_v32 = vld [vmem:[%s1861_s4 + $0x8] sm:$0xff]  ;;  %v218_v33 = vld [vmem:[%s1861_s4 + $0x40] sm:$0xff]  ;;  %v220_v36 = vld [vmem:[%s1861_s4 + $0x50] sm:$0xff] }
  0x5e   : > { %1359 = vmatprep.subr.bf16.mxu1 %v1580_v13  ;;  %v302_v35 = vpack.c.bf16 %v218_v33, %v211_v32  ;;  %v210_v37 = vld [vmem:[%s1861_s4] sm:$0xff]  ;;  %v304_v39 = vpack.c.bf16 %v220_v36, %v213_v34  ;;  %v212_v41 = vld [vmem:[%s1861_s4 + $0x10] sm:$0xff]  ;;  %v219_v42 = vld [vmem:[%s1861_s4 + $0x48] sm:$0xff] }
  0x5f   : > { %v301_v40 = vpack.c.bf16 %v217_v38, %v210_v37  ;;  %v303_v44 = vpack.c.bf16 %v219_v42, %v212_v41  ;;  %v1600_v46 = vld [vmem:[#allocation4 + $0x100] sm:$0xff]   ;;  %v227_v50 = vld [vmem:[%s1861_s4 + $0x88] sm:$0xff]  ;;  %v234_v51 = vld [vmem:[%s1861_s4 + $0xc0] sm:$0xff] }
  0x60   : > { %1302 = vmatpush3.bf16.msra.mxu0 %v1581_v14  ;;  %796 = vmatprep.mubr.bf16.mxu0 %v302_v35  ;;  %v1601_v47 = vld [vmem:[#allocation4 + $0x180] sm:$0xff]   ;;  %v311_v53 = vpack.c.bf16 %v234_v51, %v227_v50  ;;  %v1602_v54 = vld [vmem:[#allocation4 + $0x148] sm:$0xff]   ;;  %v231_v56 = vld [vmem:[%s1861_s4 + $0xa8] sm:$0xff] }
  0x61   : > { %1360 = vmatpush3.bf16.msra.mxu1 %v1582_v15  ;;  %1303 = vmatprep.subr.bf16.mxu0 %v1583_v16  ;;  %v225_v48 = vld [vmem:[%s1861_s4 + $0x78] sm:$0xff]  ;;  %v232_v49 = vld [vmem:[%s1861_s4 + $0xb0] sm:$0xff]  ;;  %v226_v57 = vld [vmem:[%s1861_s4 + $0x80] sm:$0xff] }
  0x62   : > { %1361 = vmatprep.subr.bf16.mxu1 %v1584_v17  ;;  %884 = vmatprep.mubr.bf16.mxu1 %v304_v39  ;;  %v309_v52 = vpack.c.bf16 %v232_v49, %v225_v48  ;;  %v224_v55 = vld [vmem:[%s1861_s4 + $0x70] sm:$0xff]  ;;  %v233_v59 = vld [vmem:[%s1861_s4 + $0xb8] sm:$0xff]  ;;  %v1604_v62 = vld [vmem:[#allocation4 + $0x150] sm:$0xff]  }
  0x63   : > { %v308_v58 = vpack.c.bf16 %v231_v56, %v224_v55  ;;  %v310_v60 = vpack.c.bf16 %v233_v59, %v226_v57  ;;  %v1603_v61 = vld [vmem:[#allocation4 + $0x108] sm:$0xff]   ;;  %v239_v63 = vld [vmem:[%s1861_s4 + $0xe8] sm:$0xff]  ;;  %v248_v3 = vld [vmem:[%s1861_s4 + $0x130] sm:$0xff] }
  0x64   : > { %1304 = vmatpush3.bf16.msra.mxu0 %v1585_v18  ;;  %v246_v0 = vld [vmem:[%s1861_s4 + $0x120] sm:$0xff]  ;;  %v241_v2 = vld [vmem:[%s1861_s4 + $0xf8] sm:$0xff]  ;;  %v240_v8 = vld [vmem:[%s1861_s4 + $0xf0] sm:$0xff] }
  0x65   : > { %1362 = vmatpush3.bf16.msra.mxu1 %v1586_v19  ;;  %1305 = vmatprep.subr.bf16.mxu0 %v1587_v20  ;;  %v316_v1 = vpack.c.bf16 %v246_v0, %v239_v63  ;;  %v318_v4 = vpack.c.bf16 %v248_v3, %v241_v2  ;;  %v1605_v5 = vld [vmem:[#allocation4 + $0x110] sm:$0xff]   ;;  %v245_v7 = vld [vmem:[%s1861_s4 + $0x118] sm:$0xff]  ;;  %v1606_v10 = vld [vmem:[#allocation4 + $0x158] sm:$0xff]  }
  0x66   : > { %1363 = vmatprep.subr.bf16.mxu1 %v1588_v21  ;;  %v238_v6 = vld [vmem:[%s1861_s4 + $0xe0] sm:$0xff]  ;;  %v247_v9 = vld [vmem:[%s1861_s4 + $0x128] sm:$0xff]  ;;  %v253_v14 = vld [vmem:[%s1861_s4 + $0x158] sm:$0xff] }
  0x67   : > { %v315_v11 = vpack.c.bf16 %v245_v7, %v238_v6  ;;  %v1607_v12 = vld [vmem:[#allocation4 + $0x118] sm:$0xff]   ;;  %v317_v13 = vpack.c.bf16 %v247_v9, %v240_v8  ;;  %v262_v18 = vld [vmem:[%s1861_s4 + $0x1a0] sm:$0xff]  ;;  %v273_v37 = vld [vmem:[%s1861_s4 + $0x1f8] sm:$0xff] }
  0x68   : > { %1306 = vmatpush3.bf16.msra.mxu0 %v1589_v22  ;;  %v260_v15 = vld [vmem:[%s1861_s4 + $0x190] sm:$0xff]  ;;  %v255_v16 = vld [vmem:[%s1861_s4 + $0x168] sm:$0xff]  ;;  %v1610_v33 = vld [vmem:[#allocation4 + $0x168] sm:$0xff]  }
  0x69   : > { %1364 = vmatpush3.bf16.msra.mxu1 %v1590_v23  ;;  %1307 = vmatprep.subr.bf16.mxu0 %v1591_v24  ;;  %v323_v17 = vpack.c.bf16 %v260_v15, %v253_v14  ;;  %v325_v19 = vpack.c.bf16 %v262_v18, %v255_v16  ;;  %v252_v20 = vld [vmem:[%s1861_s4 + $0x150] sm:$0xff]  ;;  %v259_v21 = vld [vmem:[%s1861_s4 + $0x188] sm:$0xff]  ;;  %v254_v23 = vld [vmem:[%s1861_s4 + $0x160] sm:$0xff] }
  0x6a   : > { %1365 = vmatprep.subr.bf16.mxu1 %v1592_v25  ;;  %v1608_v22 = vld [vmem:[#allocation4 + $0x160] sm:$0xff]   ;;  %v1611_v35 = vld [vmem:[#allocation4 + $0x128] sm:$0xff]   ;;  %v275_v39 = vld [vmem:[%s1861_s4 + $0x208] sm:$0xff] }
  0x6b   : > { %v1609_v24 = vld [vmem:[#allocation4 + $0x120] sm:$0xff]   ;;  %v266_v36 = vld [vmem:[%s1861_s4 + $0x1c0] sm:$0xff]  ;;  %v1614_v50 = vld [vmem:[#allocation4 + $0x178] sm:$0xff]  }
  0x6c   : > { %1308 = vmatpush3.bf16.msra.mxu0 %v1593_v26  ;;  %v261_v25 = vld [vmem:[%s1861_s4 + $0x198] sm:$0xff]  ;;  %v267_v26 = vld [vmem:[%s1861_s4 + $0x1c8] sm:$0xff]  ;;  %v268_v38 = vld [vmem:[%s1861_s4 + $0x1d0] sm:$0xff] }
  0x6d   : > { %1366 = vmatpush3.bf16.msra.mxu1 %v1594_v27  ;;  %1309 = vmatprep.subr.bf16.mxu0 %v1595_v28  ;;  %v274_v27 = vld [vmem:[%s1861_s4 + $0x200] sm:$0xff]  ;;  %v269_v28 = vld [vmem:[%s1861_s4 + $0x1d8] sm:$0xff]  ;;  %v288_v41 = vld [vmem:[%s1861_s4 + $0x270] sm:$0xff]  ;;  %v331_v48 = vpack.c.bf16 %v275_v39, %v268_v38 }
  0x6e   : > { %1367 = vmatprep.subr.bf16.mxu1 %v1596_v29  ;;  %v276_v29 = vld [vmem:[%s1861_s4 + $0x210] sm:$0xff]  ;;  %v330_v32 = vpack.c.bf16 %v274_v27, %v267_v26  ;;  %v1612_v42 = vld [vmem:[#allocation4 + $0x170] sm:$0xff]   ;;  %v289_v56 = vld [vmem:[%s1861_s4 + $0x278] sm:$0xff] }
  0x6f   : > { %v332_v34 = vpack.c.bf16 %v276_v29, %v269_v28  ;;  %v282_v55 = vld [vmem:[%s1861_s4 + $0x240] sm:$0xff]  ;;  %v295_v57 = vld [vmem:[%s1861_s4 + $0x2a8] sm:$0xff]  ;;  %v296_v0 = vld [vmem:[%s1861_s4 + $0x2b0] sm:$0xff] }
  0x70   : > { %1310 = vmatpush3.bf16.msra.mxu0 %v1597_v30  ;;  %v322_v30 = vpack.c.bf16 %v259_v21, %v252_v20  ;;  %v294_v63 = vld [vmem:[%s1861_s4 + $0x2a0] sm:$0xff]  ;;  %v221_v7 = vld [vmem:[%s1861_s4 + $0x58] sm:$0xff]  ;;  %v216_v8 = vld [vmem:[%s1861_s4 + $0x30] sm:$0xff] }
  0x71   : > { %1368 = vmatpush3.bf16.msra.mxu1 %v1598_v31  ;;  %1411 = vmatprep.subr.bf16.mxu0 %v1599_v45  ;;  %v324_v31 = vpack.c.bf16 %v261_v25, %v254_v23  ;;  %v283_v45 = vld [vmem:[%s1861_s4 + $0x248] sm:$0xff]  ;;  %v222_v2 = vld [vmem:[%s1861_s4 + $0x60] sm:$0xff]  ;;  %v343_v3 = vpack.c.bf16 %v294_v63, %v294_v63  ;;  %v228_v15 = vld [vmem:[%s1861_s4 + $0x90] sm:$0xff] }
  0x72   : > { %1477 = vmatprep.subr.bf16.mxu1 %v1720_v43  ;;  %v214_v6 = vld [vmem:[%s1861_s4 + $0x20] sm:$0xff]  ;;  %v223_v9 = vld [vmem:[%s1861_s4 + $0x68] sm:$0xff]  ;;  %v237_v18 = vld [vmem:[%s1861_s4 + $0xd8] sm:$0xff] }
  0x73   : > { %797 = vmatmul.mubr.bf16.vlgmr.msra.gmra.mrb[0].mxu0 %v301_v40  ;;  %v281_v40 = vld [vmem:[%s1861_s4 + $0x238] sm:$0xff]  ;;  %v235_v16 = vld [vmem:[%s1861_s4 + $0xc8] sm:$0xff]  ;;  %v250_v20 = vld [vmem:[%s1861_s4 + $0x140] sm:$0xff] }
  0x74   : > { %885 = vmatmul.mubr.bf16.vlgmr.msra.gmra.mrb[0].mxu1 %v303_v44  ;;  %1412 = vmatpush3.bf16.msra.mxu0 %v1600_v46  ;;  %v1613_v44 = vld [vmem:[#allocation4 + $0x130] sm:$0xff]   ;;  %v337_v49 = vpack.c.bf16 %v288_v41, %v281_v40  ;;  %v312_v21 = vpack.c.bf16 %v235_v16, %v228_v15  ;;  %v249_v25 = vld [vmem:[%s1861_s4 + $0x138] sm:$0xff]  ;;  %v244_v26 = vld [vmem:[%s1861_s4 + $0x110] sm:$0xff] }
  0x75   : > { %1478 = vmatpush3.bf16.msra.mxu1 %v1601_v47  ;;  %804 = vmatprep.mubr.bf16.mxu0 %v309_v52  ;;  %v290_v46 = vld [vmem:[%s1861_s4 + $0x280] sm:$0xff]  ;;  %v329_v47 = vpack.c.bf16 %v273_v37, %v266_v36  ;;  %v1615_v52 = vld [vmem:[#allocation4 + $0x138] sm:$0xff]   ;;  %v257_v28 = vld [vmem:[%s1861_s4 + $0x178] sm:$0xff] }
  0x76   : > { %892 = vmatprep.mubr.bf16.mxu1 %v311_v53  ;;  %1413 = vmatprep.subr.bf16.mxu0 %v1602_v54  ;;  %v339_v51 = vpack.c.bf16 %v290_v46, %v283_v45  ;;  %v280_v53 = vld [vmem:[%s1861_s4 + $0x230] sm:$0xff]  ;;  %v287_v54 = vld [vmem:[%s1861_s4 + $0x268] sm:$0xff]  ;;  %v265_v36 = vld [vmem:[%s1861_s4 + $0x1b8] sm:$0xff] }
  0x77   : > { %v336_v59 = vpack.c.bf16 %v287_v54, %v280_v53  ;;  %v251_v27 = vld [vmem:[%s1861_s4 + $0x148] sm:$0xff]  ;;  %v264_v29 = vld [vmem:[%s1861_s4 + $0x1b0] sm:$0xff]  ;;  %v278_v38 = vld [vmem:[%s1861_s4 + $0x220] sm:$0xff] }
  0x78   : > { %1414 = vmatpush3.bf16.msra.mxu0 %v1603_v61  ;;  %v344_v61 = vpack.c.bf16 %v295_v57, %v295_v57  ;;  %v271_v37 = vld [vmem:[%s1861_s4 + $0x1e8] sm:$0xff]  ;;  %v272_v45 = vld [vmem:[%s1861_s4 + $0x1f0] sm:$0xff]  ;;  %v286_v54 = vld [vmem:[%s1861_s4 + $0x260] sm:$0xff] }
  0x79   : > { %1415 = vmatprep.subr.bf16.mxu0 %v1604_v62  ;;  %v334_v41 = vpack.c.bf16 %v278_v38, %v271_v37  ;;  %v279_v46 = vld [vmem:[%s1861_s4 + $0x228] sm:$0xff] }
  0x7a   : > { %v291_v53 = vld [vmem:[%s1861_s4 + $0x288] sm:$0xff] }
  0x7b   : > { %805 = vmatmul.mubr.bf16.gmra.mrb[4].mxu0 %v308_v58  ;;  %v297_v58 = vld [vmem:[%s1861_s4 + $0x2b8] sm:$0xff] }
  0x7c   : > { %893 = vmatmul.mubr.bf16.gmra.mrb[4].mxu1 %v310_v60  ;;  %812 = vmatprep.mubr.bf16.mxu0 %v316_v1  ;;  %v338_v60 = vpack.c.bf16 %v289_v56, %v282_v55  ;;  %v346_v62 = vpack.c.bf16 %v297_v58, %v297_v58  ;;  %v215_v1 = vld [vmem:[%s1861_s4 + $0x28] sm:$0xff]  ;;  %v293_v55 = vld [vmem:[%s1861_s4 + $0x298] sm:$0xff] }
  0x7d   : > { %900 = vmatprep.mubr.bf16.mxu1 %v318_v4  ;;  %1416 = vmatpush3.bf16.msra.mxu0 %v1605_v5  ;;  %v345_v4 = vpack.c.bf16 %v296_v0, %v296_v0  ;;  %v306_v5 = vpack.c.bf16 %v222_v2, %v215_v1  ;;  %v299_v56 = vld [vmem:[%s1861_s4 + $0x2c8] sm:$0xff]  ;;  %v342_v58 = vpack.c.bf16 %v293_v55, %v286_v54 }
  0x7e   : > { %1417 = vmatprep.subr.bf16.mxu0 %v1606_v10  ;;  %v229_v10 = vld [vmem:[%s1861_s4 + $0x98] sm:$0xff] }
  0x81   : > { %1418 = vmatpush3.bf16.msra.mxu0 %v1607_v12  ;;  %v305_v12 = vpack.c.bf16 %v221_v7, %v214_v6 }
  0x82   : > { %1419 = vmatprep.subr.bf16.mxu0 %v1608_v22 }
  0x83   : > { %813 = vmatmul.mubr.bf16.gmra.mrb[8].mxu0 %v315_v11  ;;  %v236_v11 = vld [vmem:[%s1861_s4 + $0xd0] sm:$0xff] }
  0x84   : > { %901 = vmatmul.mubr.bf16.gmra.mrb[8].mxu1 %v317_v13  ;;  %820 = vmatprep.mubr.bf16.mxu0 %v323_v17  ;;  %v307_v13 = vpack.c.bf16 %v223_v9, %v216_v8  ;;  %v313_v14 = vpack.c.bf16 %v236_v11, %v229_v10  ;;  %v230_v17 = vld [vmem:[%s1861_s4 + $0xa0] sm:$0xff] }
  0x85   : > { %908 = vmatprep.mubr.bf16.mxu1 %v325_v19  ;;  %1420 = vmatpush3.bf16.msra.mxu0 %v1609_v24  ;;  %v243_v19 = vld [vmem:[%s1861_s4 + $0x108] sm:$0xff]  ;;  %v314_v22 = vpack.c.bf16 %v237_v18, %v230_v17  ;;  %v242_v24 = vld [vmem:[%s1861_s4 + $0x100] sm:$0xff] }
  0x86   : > { %1421 = vmatprep.subr.bf16.mxu0 %v1610_v33  ;;  %v320_v23 = vpack.c.bf16 %v250_v20, %v243_v19  ;;  %v256_v33 = vld [vmem:[%s1861_s4 + $0x170] sm:$0xff] }
  0x89   : > { %1422 = vmatpush3.bf16.msra.mxu0 %v1611_v35  ;;  %v258_v35 = vld [vmem:[%s1861_s4 + $0x180] sm:$0xff] }
  0x8a   : > { %1423 = vmatprep.subr.bf16.mxu0 %v1612_v42  ;;  %v328_v40 = vpack.c.bf16 %v265_v36, %v258_v35  ;;  %v270_v42 = vld [vmem:[%s1861_s4 + $0x1e0] sm:$0xff] }
  0x8b   : > { %821 = vmatmul.mubr.bf16.gmra.mrb[12].mxu0 %v322_v30  ;;  %v319_v30 = vpack.c.bf16 %v249_v25, %v242_v24 }
  0x8c   : > { %909 = vmatmul.mubr.bf16.gmra.mrb[12].mxu1 %v324_v31  ;;  %828 = vmatprep.mubr.bf16.mxu0 %v330_v32  ;;  %v321_v31 = vpack.c.bf16 %v251_v27, %v244_v26  ;;  %v327_v32 = vpack.c.bf16 %v264_v29, %v257_v28 }
  0x8d   : > { %916 = vmatprep.mubr.bf16.mxu1 %v332_v34  ;;  %1424 = vmatpush3.bf16.msra.mxu0 %v1613_v44  ;;  %v263_v34 = vld [vmem:[%s1861_s4 + $0x1a8] sm:$0xff]  ;;  %v277_v44 = vld [vmem:[%s1861_s4 + $0x218] sm:$0xff] }
  0x8e   : > { %1425 = vmatprep.subr.bf16.mxu0 %v1614_v50  ;;  %v326_v39 = vpack.c.bf16 %v263_v34, %v256_v33  ;;  %v335_v50 = vpack.c.bf16 %v279_v46, %v272_v45 }
  0x91   : > { %1426 = vmatpush3.bf16.msra.mxu0 %v1615_v52  ;;  %v284_v52 = vld [vmem:[%s1861_s4 + $0x250] sm:$0xff] }
  0x92   : > { %v340_v57 = vpack.c.bf16 %v291_v53, %v284_v52 }
  0x93   : > { %829 = vmatmul.mubr.bf16.gmra.mrb[16].mxu0 %v329_v47  ;;  %v285_v47 = vld [vmem:[%s1861_s4 + $0x258] sm:$0xff] }
  0x94   : > { %917 = vmatmul.mubr.bf16.gmra.mrb[16].mxu1 %v331_v48  ;;  %836 = vmatprep.mubr.bf16.mxu0 %v337_v49  ;;  %v292_v48 = vld [vmem:[%s1861_s4 + $0x290] sm:$0xff]  ;;  %v333_v49 = vpack.c.bf16 %v277_v44, %v270_v42 }
  0x95   : > { %924 = vmatprep.mubr.bf16.mxu1 %v339_v51  ;;  %v341_v51 = vpack.c.bf16 %v292_v48, %v285_v47 }
  0x9b   : > { %837 = vmatmul.mubr.bf16.gmra.mrb[20].mxu0 %v336_v59  ;;  %v348_v59 = vpack.c.bf16 %v299_v56, %v299_v56 }
  0x9c   : > { %925 = vmatmul.mubr.bf16.gmra.mrb[20].mxu1 %v338_v60  ;;  %844 = vmatprep.mubr.bf16.mxu0 %v344_v61  ;;  %v298_v60 = vld [vmem:[%s1861_s4 + $0x2c0] sm:$0xff]  ;;  %v300_v61 = vld [vmem:[%s1861_s4 + $0x2d0] sm:$0xff] }
  0x9d   : > { %932 = vmatprep.mubr.bf16.mxu1 %v346_v62  ;;  %v347_v62 = vpack.c.bf16 %v298_v60, %v298_v60  ;;  %v349_v63 = vpack.c.bf16 %v300_v61, %v300_v61 }
  0xa3   : > { %845 = vmatmul.mubr.bf16.gmra.mrb[24].mxu0 %v343_v3 }
  0xa4   : > { %933 = vmatmul.mubr.bf16.gmra.mrb[24].mxu1 %v345_v4  ;;  %972 = vmatprep.mubr.bf16.mxu0 %v306_v5 }
  0xa5   : > { %1479 = vmatprep.mubr.msk.bf16.mxu1 %vm1721_vm0, %v1720_v43 }
  0xab   : > { %973 = vmatmul.mubr.bf16.vlgmr.msra.gmra.mrb[28].mxu0 %v305_v12 }
  0xac   : > { %1480 = vmatmul.mubr.msk.bf16.vlgmr.msra.gmra.mrb[28].mxu1 %vm742_vm1, %v307_v13  ;;  %980 = vmatprep.mubr.bf16.mxu0 %v313_v14 }
  0xad   : > { %1483 = vmatprep.mubr.msk.bf16.mxu1 %vm1721_vm0, %v1720_v43 }
  0xb3   : > { %981 = vmatmul.mubr.bf16.gmra.mrb[32].mxu0 %v312_v21 }
  0xb4   : > { %1484 = vmatmul.mubr.msk.bf16.gmra.mrb[32].mxu1 %vm742_vm1, %v314_v22  ;;  %988 = vmatprep.mubr.bf16.mxu0 %v320_v23 }
  0xb5   : > { %1487 = vmatprep.mubr.msk.bf16.mxu1 %vm1721_vm0, %v1720_v43 }
  0xbb   : > { %989 = vmatmul.mubr.bf16.gmra.mrb[36].mxu0 %v319_v30 }
  0xbc   : > { %1488 = vmatmul.mubr.msk.bf16.gmra.mrb[36].mxu1 %vm742_vm1, %v321_v31  ;;  %996 = vmatprep.mubr.bf16.mxu0 %v327_v32 }
  0xbd   : > { %1491 = vmatprep.mubr.msk.bf16.mxu1 %vm1721_vm0, %v1720_v43 }
  0xc3   : > { %997 = vmatmul.mubr.bf16.gmra.mrb[40].mxu0 %v326_v39 }
  0xc4   : > { %1492 = vmatmul.mubr.msk.bf16.gmra.mrb[40].mxu1 %vm742_vm1, %v328_v40  ;;  %1004 = vmatprep.mubr.bf16.mxu0 %v334_v41 }
  0xc5   : > { %1495 = vmatprep.mubr.msk.bf16.mxu1 %vm1721_vm0, %v1720_v43 }
  0xcb   : > { %1005 = vmatmul.mubr.bf16.gmra.mrb[44].mxu0 %v333_v49 }
  0xcc   : > { %1496 = vmatmul.mubr.msk.bf16.gmra.mrb[44].mxu1 %vm742_vm1, %v335_v50  ;;  %1012 = vmatprep.mubr.bf16.mxu0 %v341_v51 }
  0xcd   : > { %1499 = vmatprep.mubr.msk.bf16.mxu1 %vm1721_vm0, %v1720_v43 }
  0xd3   : > { %1013 = vmatmul.mubr.bf16.gmra.mrb[48].mxu0 %v340_v57 }
  0xd4   : > { %1500 = vmatmul.mubr.msk.bf16.gmra.mrb[48].mxu1 %vm742_vm1, %v342_v58  ;;  %1020 = vmatprep.mubr.bf16.mxu0 %v348_v59 }
  0xd5   : > { %1503 = vmatprep.mubr.msk.bf16.mxu1 %vm1721_vm0, %v1720_v43 }
  0xdb   : > { %1021 = vmatmul.mubr.bf16.gmra.mrb[52].mxu0 %v347_v62 }
  0xdc   : > { %1504 = vmatmul.mubr.msk.bf16.gmra.mrb[52].mxu1 %vm742_vm1, %v349_v63 }
 0x146   : > { %v1311_v0 = vpop.f32.mrb[0].mxu0 }
 0x147   : > { %v1369_v1 = vpop.f32.mrb[0].mxu1  ;;  %v1312_v2 = vpop.f32.mrb[1].mxu0 }
 0x148   : > { %v1313_v3 = vadd.f32 %v1312_v2, %v1311_v0  ;;  %v1370_v4 = vpop.f32.mrb[1].mxu1  ;;  %v1314_v5 = vpop.f32.mrb[2].mxu0 }
 0x149   : > { %v1371_v6 = vadd.f32 %v1370_v4, %v1369_v1  ;;  %v1372_v7 = vpop.f32.mrb[2].mxu1  ;;  %v1315_v8 = vpop.f32.mrb[3].mxu0 }
 0x14a   : > { %v1316_v9 = vadd.f32 %v1315_v8, %v1314_v5  ;;  %v1373_v10 = vpop.f32.mrb[3].mxu1 }
 0x14b   : > { %v1984_v11 = vadd.f32 %v1371_v6, %v1313_v3  ;;  %v1374_v43 = vadd.f32 %v1373_v10, %v1372_v7 }
 0x14d   : > { %v1986_v12 = vadd.f32 %v1374_v43, %v1316_v9 }
 0x14e   : > { %v1317_v13 = vpop.f32.mrb[4].mxu0 }
 0x14f   : > { %v1375_v14 = vpop.f32.mrb[4].mxu1  ;;  %v1318_v15 = vpop.f32.mrb[5].mxu0 }
 0x150   : > { %v1319_v16 = vadd.f32 %v1318_v15, %v1317_v13  ;;  %v1376_v17 = vpop.f32.mrb[5].mxu1  ;;  %v1320_v18 = vpop.f32.mrb[6].mxu0 }
 0x151   : > { %v1377_v19 = vadd.f32 %v1376_v17, %v1375_v14  ;;  %v1378_v20 = vpop.f32.mrb[6].mxu1  ;;  %v1321_v21 = vpop.f32.mrb[7].mxu0 }
 0x152   : > { %v1322_v22 = vadd.f32 %v1321_v21, %v1320_v18  ;;  %v1379_v23 = vpop.f32.mrb[7].mxu1 }
 0x153   : > { %v1988_v24 = vadd.f32 %v1377_v19, %v1319_v16  ;;  %v1380_v25 = vadd.f32 %v1379_v23, %v1378_v20 }
 0x155   : > { %v1990_v26 = vadd.f32 %v1380_v25, %v1322_v22 }
 0x156   : > { %v1323_v27 = vpop.f32.mrb[8].mxu0 }
 0x157   : > { %v1381_v28 = vpop.f32.mrb[8].mxu1  ;;  %v1324_v29 = vpop.f32.mrb[9].mxu0 }
 0x158   : > { %v1325_v30 = vadd.f32 %v1324_v29, %v1323_v27  ;;  %v1382_v31 = vpop.f32.mrb[9].mxu1  ;;  %v1326_v32 = vpop.f32.mrb[10].mxu0 }
 0x159   : > { %v1383_v33 = vadd.f32 %v1382_v31, %v1381_v28  ;;  %v1384_v34 = vpop.f32.mrb[10].mxu1  ;;  %v1327_v35 = vpop.f32.mrb[11].mxu0 }
 0x15a   : > { %v1328_v36 = vadd.f32 %v1327_v35, %v1326_v32  ;;  %v1385_v37 = vpop.f32.mrb[11].mxu1 }
 0x15b   : > { %v1992_v38 = vadd.f32 %v1383_v33, %v1325_v30  ;;  %v1386_v39 = vadd.f32 %v1385_v37, %v1384_v34 }
 0x15d   : > { %v1994_v40 = vadd.f32 %v1386_v39, %v1328_v36 }
 0x15e   : > { %v1329_v41 = vpop.f32.mrb[12].mxu0 }
 0x15f   : > { %v1387_v42 = vpop.f32.mrb[12].mxu1  ;;  %v1330_v44 = vpop.f32.mrb[13].mxu0 }
 0x160   : > { %v1331_v45 = vadd.f32 %v1330_v44, %v1329_v41  ;;  %v1388_v46 = vpop.f32.mrb[13].mxu1  ;;  %v1332_v47 = vpop.f32.mrb[14].mxu0 }
 0x161   : > { %v1389_v48 = vadd.f32 %v1388_v46, %v1387_v42  ;;  %v1390_v49 = vpop.f32.mrb[14].mxu1  ;;  %v1333_v50 = vpop.f32.mrb[15].mxu0 }
 0x162   : > { %v1334_v51 = vadd.f32 %v1333_v50, %v1332_v47  ;;  %v1391_v52 = vpop.f32.mrb[15].mxu1 }
 0x163   : > { %v1996_v53 = vadd.f32 %v1389_v48, %v1331_v45  ;;  %v1392_v54 = vadd.f32 %v1391_v52, %v1390_v49  ;;  %v2016_v48 = vld [vmem:[%s2089_s2] ss:$0 sm:$0xff] }
 0x165   : > { %v1998_v55 = vadd.f32 %v1392_v54, %v1334_v51 }
 0x166   : > { %v1335_v56 = vpop.f32.mrb[16].mxu0 }
 0x167   : > { %v1393_v57 = vpop.f32.mrb[16].mxu1  ;;  %v1336_v58 = vpop.f32.mrb[17].mxu0 }
 0x168   : > { %v1337_v59 = vadd.f32 %v1336_v58, %v1335_v56  ;;  %v1394_v60 = vpop.f32.mrb[17].mxu1  ;;  %v1338_v61 = vpop.f32.mrb[18].mxu0 }
 0x169   : > { %v1395_v62 = vadd.f32 %v1394_v60, %v1393_v57  ;;  %v1396_v63 = vpop.f32.mrb[18].mxu1  ;;  %v1339_v0 = vpop.f32.mrb[19].mxu0 }
 0x16a   : > { %v1340_v1 = vadd.f32 %v1339_v0, %v1338_v61  ;;  %v1397_v2 = vpop.f32.mrb[19].mxu1 }
 0x16b   : > { %v2000_v3 = vadd.f32 %v1395_v62, %v1337_v59  ;;  %v1398_v4 = vadd.f32 %v1397_v2, %v1396_v63 }
 0x16d   : > { %v2002_v5 = vadd.f32 %v1398_v4, %v1340_v1 }
 0x16e   : > { %v1341_v6 = vpop.f32.mrb[20].mxu0 }
 0x16f   : > { %v1399_v7 = vpop.f32.mrb[20].mxu1  ;;  %v1342_v8 = vpop.f32.mrb[21].mxu0 }
 0x170   : > { %v1343_v9 = vadd.f32 %v1342_v8, %v1341_v6  ;;  %v1400_v10 = vpop.f32.mrb[21].mxu1  ;;  %v1344_v43 = vpop.f32.mrb[22].mxu0 }
 0x171   : > { %v1401_v13 = vadd.f32 %v1400_v10, %v1399_v7  ;;  %v1402_v14 = vpop.f32.mrb[22].mxu1  ;;  %v1345_v15 = vpop.f32.mrb[23].mxu0 }
 0x172   : > { %v1346_v16 = vadd.f32 %v1345_v15, %v1344_v43  ;;  %v1403_v17 = vpop.f32.mrb[23].mxu1 }
 0x173   : > { %v2004_v18 = vadd.f32 %v1401_v13, %v1343_v9  ;;  %v1404_v19 = vadd.f32 %v1403_v17, %v1402_v14 }
 0x175   : > { %v2006_v20 = vadd.f32 %v1404_v19, %v1346_v16 }
 0x176   : > { %v1347_v21 = vpop.f32.mrb[24].mxu0 }
 0x177   : > { %v1405_v22 = vpop.f32.mrb[24].mxu1  ;;  %v1348_v23 = vpop.f32.mrb[25].mxu0 }
 0x178   : > { %v1349_v25 = vadd.f32 %v1348_v23, %v1347_v21  ;;  %v1406_v27 = vpop.f32.mrb[25].mxu1  ;;  %v1350_v28 = vpop.f32.mrb[26].mxu0 }
 0x179   : > { %v1407_v29 = vadd.f32 %v1406_v27, %v1405_v22  ;;  %v1351_v30 = vpop.f32.mrb[27].mxu0  ;;  %v1408_v31 = vpop.f32.mrb[26].mxu1 }
 0x17a   : > { %v1409_v32 = vpop.f32.mrb[27].mxu1 }
 0x17b   : > { %v2010_v33 = vadd.f32 %v1407_v29, %v1349_v25 }
 0x17e   : > { %v1427_v34 = vpop.f32.mrb[28].mxu0 }
 0x17f   : > { %v1428_v35 = vpop.f32.mrb[29].mxu0  ;;  %v1062_v36 = vpop.f32.mrb[28].mxu1 }
 0x180   : > { %v1429_v37 = vadd.f32 %v1428_v35, %v1427_v34  ;;  %v1430_v39 = vpop.f32.mrb[30].mxu0  ;;  %v1481_v41 = vpop.f32.mrb[29].mxu1 }
 0x181   : > { %v1431_v42 = vpop.f32.mrb[31].mxu0  ;;  %v1065_v44 = vpop.f32.mrb[30].mxu1 }
 0x182   : > { %v1432_v45 = vadd.f32 %v1431_v42, %v1430_v39  ;;  %v975_v46 = vadd.f32 %v1429_v37, %v1984_v11  ;;  %v1482_v47 = vpop.f32.mrb[31].mxu1 }
 0x184   : > { %v1063_v49 = vadd.f32 %v1062_v36, %v975_v46  ;;  %v978_v50 = vadd.f32 %v1432_v45, %v1986_v12 }
 0x186   : > { %v1123_v51 = vadd.f32 %v2016_v48, %v1063_v49  ;;  %v1066_v11 = vadd.f32 %v1065_v44, %v978_v50  ;;  %v1433_v52 = vpop.f32.mrb[32].mxu0 }
 0x187   : > { %v1434_v54 = vpop.f32.mrb[33].mxu0  ;;  %v1070_v56 = vpop.f32.mrb[32].mxu1 }
 0x188   : > { %1137 = vst.msk [vmem:[%s2022_s21] sm:$0xff] %vm1136_vm2, %v1123_v51  ;;  %v1124_v57 = vadd.f32 %v2016_v48, %v1066_v11  ;;  %v1435_v58 = vadd.f32 %v1434_v54, %v1433_v52  ;;  %v1436_v12 = vpop.f32.mrb[34].mxu0  ;;  %v1485_v59 = vpop.f32.mrb[33].mxu1 }
 0x189   : > { %v1437_v60 = vpop.f32.mrb[35].mxu0  ;;  %v1073_v61 = vpop.f32.mrb[34].mxu1 }
 0x18a   : > { %1138 = vst.msk [vmem:[%s2022_s21 + $0x8] sm:$0xff] %vm1136_vm2, %v1124_v57  ;;  %v1438_v62 = vadd.f32 %v1437_v60, %v1436_v12  ;;  %v983_v63 = vadd.f32 %v1435_v58, %v1988_v24  ;;  %v1486_v0 = vpop.f32.mrb[35].mxu1 }
 0x18c   : > { %v1071_v1 = vadd.f32 %v1070_v56, %v983_v63  ;;  %v986_v2 = vadd.f32 %v1438_v62, %v1990_v26 }
 0x18e   : > { %v1125_v4 = vadd.f32 %v2016_v48, %v1071_v1  ;;  %v1074_v6 = vadd.f32 %v1073_v61, %v986_v2  ;;  %v1439_v7 = vpop.f32.mrb[36].mxu0 }
 0x18f   : > { %v1440_v8 = vpop.f32.mrb[37].mxu0  ;;  %v1078_v9 = vpop.f32.mrb[36].mxu1 }
 0x190   : > { %1139 = vst.msk [vmem:[%s2022_s21 + $0x10] sm:$0xff] %vm1136_vm2, %v1125_v4  ;;  %v1126_v10 = vadd.f32 %v2016_v48, %v1074_v6  ;;  %v1441_v43 = vadd.f32 %v1440_v8, %v1439_v7  ;;  %v1442_v13 = vpop.f32.mrb[38].mxu0  ;;  %v1489_v14 = vpop.f32.mrb[37].mxu1 }
 0x191   : > { %v1443_v24 = vpop.f32.mrb[39].mxu0  ;;  %v1081_v15 = vpop.f32.mrb[38].mxu1 }
 0x192   : > { %1140 = vst.msk [vmem:[%s2022_s21 + $0x18] sm:$0xff] %vm1136_vm2, %v1126_v10  ;;  %v1444_v16 = vadd.f32 %v1443_v24, %v1442_v13  ;;  %v991_v26 = vadd.f32 %v1441_v43, %v1992_v38  ;;  %v1490_v17 = vpop.f32.mrb[39].mxu1 }
 0x194   : > { %v1079_v19 = vadd.f32 %v1078_v9, %v991_v26  ;;  %v994_v21 = vadd.f32 %v1444_v16, %v1994_v40 }
 0x196   : > { %v1127_v22 = vadd.f32 %v2016_v48, %v1079_v19  ;;  %v1082_v23 = vadd.f32 %v1081_v15, %v994_v21  ;;  %v1445_v25 = vpop.f32.mrb[40].mxu0 }
 0x197   : > { %v1446_v27 = vpop.f32.mrb[41].mxu0  ;;  %v1086_v28 = vpop.f32.mrb[40].mxu1 }
 0x198   : > { %1141 = vst.msk [vmem:[%s2022_s21 + $0x20] sm:$0xff] %vm1136_vm2, %v1127_v22  ;;  %v1128_v29 = vadd.f32 %v2016_v48, %v1082_v23  ;;  %v1447_v30 = vadd.f32 %v1446_v27, %v1445_v25  ;;  %v1448_v31 = vpop.f32.mrb[42].mxu0  ;;  %v1493_v32 = vpop.f32.mrb[41].mxu1 }
 0x199   : > { %v1449_v38 = vpop.f32.mrb[43].mxu0  ;;  %v1089_v34 = vpop.f32.mrb[42].mxu1 }
 0x19a   : > { %1142 = vst.msk [vmem:[%s2022_s21 + $0x28] sm:$0xff] %vm1136_vm2, %v1128_v29  ;;  %v1450_v35 = vadd.f32 %v1449_v38, %v1448_v31  ;;  %v999_v40 = vadd.f32 %v1447_v30, %v1996_v53  ;;  %v1494_v36 = vpop.f32.mrb[43].mxu1 }
 0x19c   : > { %v1087_v37 = vadd.f32 %v1086_v28, %v999_v40  ;;  %v1002_v39 = vadd.f32 %v1450_v35, %v1998_v55 }
 0x19e   : > { %v1129_v41 = vadd.f32 %v2016_v48, %v1087_v37  ;;  %v1090_v42 = vadd.f32 %v1089_v34, %v1002_v39  ;;  %v1451_v44 = vpop.f32.mrb[44].mxu0 }
 0x19f   : > { %v1452_v45 = vpop.f32.mrb[45].mxu0  ;;  %v1094_v46 = vpop.f32.mrb[44].mxu1 }
 0x1a0   : > { %1143 = vst.msk [vmem:[%s2022_s21 + $0x30] sm:$0xff] %vm1136_vm2, %v1129_v41  ;;  %v1130_v47 = vadd.f32 %v2016_v48, %v1090_v42  ;;  %v1453_v49 = vadd.f32 %v1452_v45, %v1451_v44  ;;  %v1454_v50 = vpop.f32.mrb[46].mxu0  ;;  %v1497_v51 = vpop.f32.mrb[45].mxu1 }
 0x1a1   : > { %v1455_v53 = vpop.f32.mrb[47].mxu0  ;;  %v1097_v11 = vpop.f32.mrb[46].mxu1 }
 0x1a2   : > { %1144 = vst.msk [vmem:[%s2022_s21 + $0x38] sm:$0xff] %vm1136_vm2, %v1130_v47  ;;  %v1456_v52 = vadd.f32 %v1455_v53, %v1454_v50  ;;  %v1007_v55 = vadd.f32 %v1453_v49, %v2000_v3  ;;  %v1498_v54 = vpop.f32.mrb[47].mxu1 }
 0x1a4   : > { %v1095_v56 = vadd.f32 %v1094_v46, %v1007_v55  ;;  %v1010_v57 = vadd.f32 %v1456_v52, %v2002_v5 }
 0x1a6   : > { %v1131_v58 = vadd.f32 %v2016_v48, %v1095_v56  ;;  %v1098_v12 = vadd.f32 %v1097_v11, %v1010_v57  ;;  %v1457_v59 = vpop.f32.mrb[48].mxu0 }
 0x1a7   : > { %v1458_v60 = vpop.f32.mrb[49].mxu0  ;;  %v1102_v61 = vpop.f32.mrb[48].mxu1 }
 0x1a8   : > { %1145 = vst.msk [vmem:[%s2022_s21 + $0x40] sm:$0xff] %vm1136_vm2, %v1131_v58  ;;  %v1132_v62 = vadd.f32 %v2016_v48, %v1098_v12  ;;  %v1459_v63 = vadd.f32 %v1458_v60, %v1457_v59  ;;  %v1460_v0 = vpop.f32.mrb[50].mxu0  ;;  %v1501_v1 = vpop.f32.mrb[49].mxu1 }
 0x1a9   : > { %v1461_v3 = vpop.f32.mrb[51].mxu0  ;;  %v1105_v2 = vpop.f32.mrb[50].mxu1 }
 0x1aa   : > { %1146 = vst.msk [vmem:[%s2022_s21 + $0x48] sm:$0xff] %vm1136_vm2, %v1132_v62  ;;  %v1462_v4 = vadd.f32 %v1461_v3, %v1460_v0  ;;  %v1015_v5 = vadd.f32 %v1459_v63, %v2004_v18  ;;  %v1502_v6 = vpop.f32.mrb[51].mxu1 }
 0x1ac   : > { %v1103_v7 = vadd.f32 %v1102_v61, %v1015_v5  ;;  %v1018_v8 = vadd.f32 %v1462_v4, %v2006_v20 }
 0x1ae   : > { %v1133_v9 = vadd.f32 %v2016_v48, %v1103_v7  ;;  %v1106_v10 = vadd.f32 %v1105_v2, %v1018_v8  ;;  %v1463_v43 = vpop.f32.mrb[52].mxu0 }
 0x1af   : > { %v1464_v13 = vpop.f32.mrb[53].mxu0  ;;  %v1110_v14 = vpop.f32.mrb[52].mxu1 }
 0x1b0   : > { %1147 = vst.msk [vmem:[%s2022_s21 + $0x50] sm:$0xff] %vm1136_vm2, %v1133_v9  ;;  %v1134_v24 = vadd.f32 %v2016_v48, %v1106_v10  ;;  %v1465_v15 = vadd.f32 %v1464_v13, %v1463_v43  ;;  %v1466_v16 = vpop.f32.mrb[54].mxu0  ;;  %v1505_v26 = vpop.f32.mrb[53].mxu1 }
 0x1b1   : > { %v1467_v18 = vpop.f32.mrb[55].mxu0  ;;  %v1113_v17 = vpop.f32.mrb[54].mxu1 }
 0x1b2   : > { %1148 = vst.msk [vmem:[%s2022_s21 + $0x58] sm:$0xff] %vm1136_vm2, %v1134_v24  ;;  %v1023_v20 = vadd.f32 %v1465_v15, %v2010_v33  ;;  %v1506_v19 = vpop.f32.mrb[55].mxu1 }
 0x1b4   : > { %v1111_v21 = vadd.f32 %v1110_v14, %v1023_v20 }
 0x1b6   : > { %v1135_v22 = vadd.f32 %v2016_v48, %v1111_v21 }
 0x1b8   : > { %1149 = vst.msk [vmem:[%s2022_s21 + $0x60] sm:$0xff] %vm1136_vm2, %v1135_v22 }
 0x1b9 PF: > { %p14_p6 = scmp.ge.s32.totalorder %s1789_s23, 4   ;;  %s2103_s12 = smov %s1704_s13 }
 0x1ba   : > { %s2104_s13 = smov %s1708_s14  ;;  %s2105_s14 = smov %s1814_s11 }
 0x1bb   : > { %s2106_s15 = smov %s1789_s23  ;;  %16 = sbr.rel (!%p14_p6) target bundleno = 4 (0x4), region = 76 }
 0x1c2   :  { %1172 = vsyncpa [#allocation3], 1 }
 0x1c3   :  { %1174 = vsyncpa [#allocation3 + $0x1], 1 }
 0x1c4   :  { %1175 = vsyncpa [#allocation5], 1 }

</bundles_post_ra>
